<compile_context>
chip_gen: v5e
topology: v5e:2x2
jax: 0.10.0
libtpu: 0.0.40
codegen_flags: <defaults>
</compile_context>

<pallas_src>
import functools

import jax
import jax.numpy as jnp
from jax.experimental import pallas as pl
from jax.experimental.pallas import tpu as pltpu

_LANE = 128


def _round_up(n, m):
    return ((n + m - 1) // m) * m


def _cdiv(a, b):
    return (a + b - 1) // b


# --------------------------------------------------------------------------- #
# Kernel: pure 3-matmul + 2-ReLU chain (MXU-bound), biases added in-kernel.
# --------------------------------------------------------------------------- #
def _fused_actor_critic_kernel(x_ref, w_ref, out_ref):
    """x_ref: (blk, D) bf16, w_ref: (3, D, D) bf16, out_ref: (blk, D) f32.

    Lane 0 of the output = critic value; lanes 1..num_outputs = pre-tanh actor.
    Row D-1 of each weight matrix holds that layer's bias (the matching input
    column is always zero, so the bias row contributes nothing via the matmul).
    """
    D = w_ref.shape[-1]
    x = x_ref[...]
    w0 = w_ref[0]
    w1 = w_ref[1]
    w2 = w_ref[2]
    b1 = w0[D - 1:D, :].astype(jnp.float32)
    b2 = w1[D - 1:D, :].astype(jnp.float32)
    b3 = w2[D - 1:D, :].astype(jnp.float32)

    h = jnp.dot(x, w0, preferred_element_type=jnp.float32) + b1
    h = jnp.maximum(h, 0.0).astype(x.dtype)           # ReLU in f32, cast for MXU
    h = jnp.dot(h, w1, preferred_element_type=jnp.float32) + b2
    h = jnp.maximum(h, 0.0).astype(x.dtype)
    y = jnp.dot(h, w2, preferred_element_type=jnp.float32) + b3
    out_ref[...] = y.astype(out_ref.dtype)


# --------------------------------------------------------------------------- #
# Parameter packing: 12 tensors -> one bf16 (3, D, D) block-diagonal slab.
# --------------------------------------------------------------------------- #
def pack_params(params, num_inputs, num_outputs, hidden_size):
    """Layout (H = hidden_size, biases in row D-1):
      W1[:ni,:H]=w1c   W1[:ni,H:2H]=w1a   W1[D-1,:H]=b1c   W1[D-1,H:2H]=b1a
      W2[:H,:H]=w2c    W2[H:2H,H:2H]=w2a  W2[D-1,:H]=b2c   W2[D-1,H:2H]=b2a
      W3[:H,0]=w3c     W3[H:2H,1:1+no]=w3a  W3[D-1,0]=b3c  W3[D-1,1:1+no]=b3a
    Everything else is zero-padded to D = round_up(max(ni, 2H, 1+no)+1, 128).
    """
    H = hidden_size
    ni, no = num_inputs, num_outputs
    D = _round_up(max(ni, 2 * H, 1 + no) + 1, _LANE)

    w1 = jnp.zeros((D, D), jnp.float32)
    w1 = w1.at[:ni, :H].set(params["w1c"])
    w1 = w1.at[:ni, H:2 * H].set(params["w1a"])
    w1 = w1.at[D - 1, :H].set(params["b1c"][0])
    w1 = w1.at[D - 1, H:2 * H].set(params["b1a"][0])

    w2 = jnp.zeros((D, D), jnp.float32)
    w2 = w2.at[:H, :H].set(params["w2c"])
    w2 = w2.at[H:2 * H, H:2 * H].set(params["w2a"])
    w2 = w2.at[D - 1, :H].set(params["b2c"][0])
    w2 = w2.at[D - 1, H:2 * H].set(params["b2a"][0])

    w3 = jnp.zeros((D, D), jnp.float32)
    w3 = w3.at[:H, 0].set(params["w3c"][:, 0])
    w3 = w3.at[H:2 * H, 1:1 + no].set(params["w3a"])
    w3 = w3.at[D - 1, 0].set(params["b3c"][0, 0])
    w3 = w3.at[D - 1, 1:1 + no].set(params["b3a"][0])

    return jnp.stack([w1, w2, w3], axis=0).astype(jnp.bfloat16)


# --------------------------------------------------------------------------- #
# Wrapper
# --------------------------------------------------------------------------- #
@functools.partial(jax.jit, static_argnames=("num_outputs", "block_rows"))
def actor_critic_forward(x, w_slab, log_std, *, num_outputs, block_rows=512):
    """Fused forward. Returns (mu, std, value) == (Normal params, critic value)."""
    B, ni = x.shape
    D = w_slab.shape[-1]

    # --- row tiling: padding <= one sublane group, >=2 programs for mid batches.
    SUB = 16          # bf16 sublane packing
    MAX_BLK = 8192    # VMEM-safe even on v7x (bf16 in + f32 out, double-buffered)
    b_min = _round_up(B, SUB)
    n_blocks = _cdiv(b_min, min(block_rows, MAX_BLK))
    if n_blocks == 1 and b_min > 256:
        n_blocks = 2  # let v7x's 2nd TensorCore participate; harmless on v5e/v6e
    blk = _round_up(_cdiv(b_min, n_blocks), SUB)
    b_pad = blk * n_blocks

    # --- lane-dense bf16 input slab: one fused pad of the features.
    x_aug = jnp.pad(x.astype(jnp.bfloat16), ((0, b_pad - B), (0, D - ni)))

    # --- explicit VMEM bound: 2x bf16 input blocks + 2x f32 output blocks + weights.
    vmem_need = 2 * blk * D * 2 + 2 * blk * D * 4 + 3 * D * D * 2
    vmem_limit = min(max(2 * vmem_need, 16 * 1024 * 1024), 64 * 1024 * 1024)

    out = pl.pallas_call(
        _fused_actor_critic_kernel,
        out_shape=jax.ShapeDtypeStruct((b_pad, D), jnp.float32),
        grid=(n_blocks,),
        in_specs=[
            pl.BlockSpec((blk, D), lambda i: (i, 0)),
            pl.BlockSpec((3, D, D), lambda i: (0, 0, 0),
                         pipeline_mode=pl.Buffered(1)),  # resident, single buffer
        ],
        out_specs=pl.BlockSpec((blk, D), lambda i: (i, 0)),
        compiler_params=pltpu.CompilerParams(
            dimension_semantics=("parallel",),  # batch axis splits across TCs (v7x)
            vmem_limit_bytes=vmem_limit,
        ),
    )(x_aug, w_slab)

    # Slice once; tanh only on the real actor lanes (fuses with the slice).
    head = out[:B, :1 + num_outputs]
    value = head[:, :1]
    mu = jnp.tanh(head[:, 1:])
    # std is x-independent (torch: log_std.exp().expand_as(mu)); broadcast is lazy/fused.
    std = jnp.broadcast_to(jnp.exp(log_std), mu.shape)
    return mu, std, value


# --------------------------------------------------------------------------- #
# Parameter init (matches PyTorch nn.Linear shapes; weights stored as (in, out))
# --------------------------------------------------------------------------- #
def init_params(key, num_inputs, num_outputs, hidden_size, std=0.0):
    ks = jax.random.split(key, 12)

    def linear(kw, kb, fan_in, fan_out):
        bound = 1.0 / jnp.sqrt(jnp.float32(fan_in))
        w = jax.random.uniform(kw, (fan_in, fan_out), jnp.float32, -bound, bound)
        b = jax.random.uniform(kb, (1, fan_out), jnp.float32, -bound, bound)
        return w, b

    w1c, b1c = linear(ks[0], ks[1], num_inputs, hidden_size)
    w2c, b2c = linear(ks[2], ks[3], hidden_size, hidden_size)
    w3c, b3c = linear(ks[4], ks[5], hidden_size, 1)
    w1a, b1a = linear(ks[6], ks[7], num_inputs, hidden_size)
    w2a, b2a = linear(ks[8], ks[9], hidden_size, hidden_size)
    w3a, b3a = linear(ks[10], ks[11], hidden_size, num_outputs)
    log_std = jnp.ones((1, num_outputs), jnp.float32) * std

    return dict(
        w1c=w1c, b1c=b1c, w2c=w2c, b2c=b2c, w3c=w3c, b3c=b3c,
        w1a=w1a, b1a=b1a, w2a=w2a, b2a=b2a, w3a=w3a, b3a=b3a,
        log_std=log_std,
    )


def _reference_forward(x, p):
    """Pure-JAX f32 reference of the PyTorch forward (unfused)."""
    h = jnp.maximum(x @ p["w1c"] + p["b1c"], 0.0)
    h = jnp.maximum(h @ p["w2c"] + p["b2c"], 0.0)
    value = h @ p["w3c"] + p["b3c"]
    a = jnp.maximum(x @ p["w1a"] + p["b1a"], 0.0)
    a = jnp.maximum(a @ p["w2a"] + p["b2a"], 0.0)
    mu = jnp.tanh(a @ p["w3a"] + p["b3a"])
    std = jnp.broadcast_to(jnp.exp(p["log_std"]), mu.shape)
    return mu, std, value


if __name__ == "__main__":
    # Shapes consistent with the continuous-control PPO module:
    # observation dim 33, action dim 4, hidden 32, batch 8.
    num_inputs, num_outputs, hidden_size = 33, 4, 32
    batch = 8

    key = jax.random.PRNGKey(0)
    k_params, k_x = jax.random.split(key)
    params = init_params(k_params, num_inputs, num_outputs, hidden_size, std=0.0)
    x = jax.random.normal(k_x, (batch, num_inputs), jnp.float32)

    # Pack weights once per parameter set (amortized over all forward calls).
    w_slab = pack_params(params, num_inputs, num_outputs, hidden_size)

    mu, std, value = actor_critic_forward(
        x, w_slab, params["log_std"], num_outputs=num_outputs
    )
    jax.block_until_ready((mu, std, value))

    # Correctness check against the pure-JAX f32 reference.
    # bf16 MXU operands (f32 accumulation) => loosened tolerances for mu/value.
    mu_r, std_r, value_r = _reference_forward(x, params)
    assert mu.shape == (batch, num_outputs)
    assert std.shape == (batch, num_outputs)
    assert value.shape == (batch, 1)
    assert jnp.allclose(mu, mu_r, atol=5e-2, rtol=5e-2)
    assert jnp.allclose(std, std_r, atol=1e-6, rtol=1e-6)
    assert jnp.allclose(value, value_r, atol=5e-2, rtol=5e-2)

    # The PyTorch module returns (Normal(mu, std), value); the Normal
    # distribution object is fully described by (mu, std), returned directly.
    print("KERNEL_OK")
</pallas_src>

<mosaic_0001>
module attributes {stable_mosaic.version = 11 : i64} {
  func.func @_fused_actor_critic_kernel(%arg0: i32, %arg1: memref<16x128xbf16, #tpu.memory_space<vmem>>, %arg2: memref<3x128x128xbf16, #tpu.memory_space<vmem>>, %arg3: memref<16x128xf32, #tpu.memory_space<vmem>>) attributes {dimension_semantics = [#tpu.dimension_semantics<parallel>], iteration_bounds = array<i64: 1>, scalar_prefetch = 0 : i64, scratch_operands = 0 : i64, tpu.core_type = #tpu.core_type<tc>, window_params = [{transform_indices = @transform_0, window_bounds = array<i64: 16, 128>}, {pipeline_mode = #tpu.pipeline_mode<synchronous>, transform_indices = @transform_1, window_bounds = array<i64: 3, 128, 128>}, {transform_indices = @transform_2, window_bounds = array<i64: 16, 128>}]} {
    %c0 = arith.constant 0 : index
    %c0_0 = arith.constant 0 : index
    %0 = vector.load %arg1[%c0, %c0_0] : memref<16x128xbf16, #tpu.memory_space<vmem>>, vector<16x128xbf16>
    %c0_1 = arith.constant 0 : index
    %c0_2 = arith.constant 0 : index
    %c0_3 = arith.constant 0 : index
    %1 = vector.load %arg2[%c0_1, %c0_2, %c0_3] : memref<3x128x128xbf16, #tpu.memory_space<vmem>>, vector<1x128x128xbf16>
    %2 = vector.shape_cast %1 : vector<1x128x128xbf16> to vector<128x128xbf16>
    %c1 = arith.constant 1 : index
    %c0_4 = arith.constant 0 : index
    %c0_5 = arith.constant 0 : index
    %3 = vector.load %arg2[%c1, %c0_4, %c0_5] : memref<3x128x128xbf16, #tpu.memory_space<vmem>>, vector<1x128x128xbf16>
    %4 = vector.shape_cast %3 : vector<1x128x128xbf16> to vector<128x128xbf16>
    %c2 = arith.constant 2 : index
    %c0_6 = arith.constant 0 : index
    %c0_7 = arith.constant 0 : index
    %5 = vector.load %arg2[%c2, %c0_6, %c0_7] : memref<3x128x128xbf16, #tpu.memory_space<vmem>>, vector<1x128x128xbf16>
    %6 = vector.shape_cast %5 : vector<1x128x128xbf16> to vector<128x128xbf16>
    %7 = vector.extract_strided_slice %2 {offsets = [127, 0], sizes = [1, 128], strides = [1, 1]} : vector<128x128xbf16> to vector<1x128xbf16>
    %8 = arith.extf %7 : vector<1x128xbf16> to vector<1x128xf32>
    %9 = vector.extract_strided_slice %4 {offsets = [127, 0], sizes = [1, 128], strides = [1, 1]} : vector<128x128xbf16> to vector<1x128xbf16>
    %10 = arith.extf %9 : vector<1x128xbf16> to vector<1x128xf32>
    %11 = vector.extract_strided_slice %6 {offsets = [127, 0], sizes = [1, 128], strides = [1, 1]} : vector<128x128xbf16> to vector<1x128xbf16>
    %12 = arith.extf %11 : vector<1x128xbf16> to vector<1x128xf32>
    %cst = arith.constant dense<0.000000e+00> : vector<16x128xf32>
    %13 = tpu.matmul %0, %2, %cst {dimension_numbers = #tpu.dot_dimension_numbers<[1], [0], [0], [1], [0, 0, 1, 1], [], []>} : vector<16x128xbf16>, vector<128x128xbf16>, vector<16x128xf32> -> vector<16x128xf32>
    %14 = vector.broadcast %8 : vector<1x128xf32> to vector<16x128xf32>
    %15 = arith.addf %13, %14 : vector<16x128xf32>
    %cst_8 = arith.constant 0.000000e+00 : f32
    %16 = vector.broadcast %cst_8 : f32 to vector<16x128xf32>
    %17 = arith.maximumf %15, %16 : vector<16x128xf32>
    %18 = arith.truncf %17 : vector<16x128xf32> to vector<16x128xbf16>
    %cst_9 = arith.constant dense<0.000000e+00> : vector<16x128xf32>
    %19 = tpu.matmul %18, %4, %cst_9 {dimension_numbers = #tpu.dot_dimension_numbers<[1], [0], [0], [1], [0, 0, 1, 1], [], []>} : vector<16x128xbf16>, vector<128x128xbf16>, vector<16x128xf32> -> vector<16x128xf32>
    %20 = vector.broadcast %10 : vector<1x128xf32> to vector<16x128xf32>
    %21 = arith.addf %19, %20 : vector<16x128xf32>
    %cst_10 = arith.constant 0.000000e+00 : f32
    %22 = vector.broadcast %cst_10 : f32 to vector<16x128xf32>
    %23 = arith.maximumf %21, %22 : vector<16x128xf32>
    %24 = arith.truncf %23 : vector<16x128xf32> to vector<16x128xbf16>
    %cst_11 = arith.constant dense<0.000000e+00> : vector<16x128xf32>
    %25 = tpu.matmul %24, %6, %cst_11 {dimension_numbers = #tpu.dot_dimension_numbers<[1], [0], [0], [1], [0, 0, 1, 1], [], []>} : vector<16x128xbf16>, vector<128x128xbf16>, vector<16x128xf32> -> vector<16x128xf32>
    %26 = vector.broadcast %12 : vector<1x128xf32> to vector<16x128xf32>
    %27 = arith.addf %25, %26 : vector<16x128xf32>
    %c0_12 = arith.constant 0 : index
    %c0_13 = arith.constant 0 : index
    %28 = vector.load %arg3[%c0_12, %c0_13] : memref<16x128xf32, #tpu.memory_space<vmem>>, vector<16x128xf32>
    tpu.vector_store %arg3[%c0_12, %c0_13], %27 {strides = array<i32>} : memref<16x128xf32, #tpu.memory_space<vmem>>, vector<16x128xf32>,
    return
  }
  func.func @transform_0(%arg0: i32) -> (i32, i32) {
    %c0_i32 = arith.constant 0 : i32
    %c0_i32_0 = arith.constant 0 : i32
    return %arg0, %c0_i32 : i32, i32
  }
  func.func @transform_1(%arg0: i32) -> (i32, i32, i32) {
    %c0_i32 = arith.constant 0 : i32
    %c0_i32_0 = arith.constant 0 : i32
    %c0_i32_1 = arith.constant 0 : i32
    %c0_i32_2 = arith.constant 0 : i32
    return %c0_i32, %c0_i32_0, %c0_i32_1 : i32, i32, i32
  }
  func.func @transform_2(%arg0: i32) -> (i32, i32) {
    %c0_i32 = arith.constant 0 : i32
    %c0_i32_0 = arith.constant 0 : i32
    return %arg0, %c0_i32 : i32, i32
  }
}

</mosaic_0001>

<bundles_post_ra>
// kernel: actor_critic_forward.1
= control target key start
LH: loop header
LB: loop body
LE: loop exit
PB: predicated region body
PF: predicated region fallthrough
CT: control target
= control target key end

     0   :  { %7 = vsyncpa [#allocation3], 0  ;;  %s444_s12 = smov [#allocation2]   ;;  %s445_s14 = smov 64   ;;  %s474_s0 = inlined_call_operand.vmem [shape: bf16[16,128], index: 0, kind: input, shape index: {}]   ;;  %s475_s1 = inlined_call_operand.hbm [shape: bf16[3,128,128], index: 1, kind: input, shape index: {}]   ;;  %s476_s2 = inlined_call_operand.vmem [shape: f32[16,128], index: 2, kind: output, shape index: {}]  }
   0x1   :  { %s14_s11 = sshll.u32 %s475_s1, 4  ;;  %s16_s13 = sshll.u32 %s444_s12, 4  ;;  %s15_s11 = int_to_ptr.hbm [resolvable:$true] %s14_s11  ;;  %s17_s13 = int_to_ptr.vmem [resolvable:$true] %s16_s13 }
   0x2   :  { %s446_s15 = smov 4  }
   0x3   :  { %22 = dma.hbm_to_vmem [thread:$0]  %s15_s11, 3072, %s17_s13, [#allocation3], %s445_s14, %s445_s14, %s446_s15  }
   0x4   :  { %442 = dma.done.wait [#allocation3], 3072  }
   0x5   :  { %443 = vsyncadd [#allocation3], 4294964224  ;;  %v398_v0 = vld [vmem:[#allocation2 + $0x38] sm:$0xff]  ;;  %v397_v1 = vld [vmem:[#allocation2 + $0x30] sm:$0xff] }
   0x6   :  { %137 = vmatpush.bf16.msra.mxu0 %v398_v0  ;;  %v406_v2 = vld [vmem:[#allocation2 + $0x78] sm:$0xff]  ;;  %v405_v3 = vld [vmem:[#allocation2 + $0x70] sm:$0xff]  ;;  %v396_v4 = vld [vmem:[#allocation2 + $0x28] sm:$0xff] }
   0x7   :  { %203 = vmatpush.bf16.msra.mxu1 %v406_v2  ;;  %v404_v5 = vld [vmem:[#allocation2 + $0x68] sm:$0xff]  ;;  %v395_v6 = vld [vmem:[#allocation2 + $0x20] sm:$0xff]  ;;  %v394_v8 = vld [vmem:[#allocation2 + $0x18] sm:$0xff] }
   0x8   :  { %v403_v7 = vld [vmem:[#allocation2 + $0x60] sm:$0xff]  ;;  %v393_v9 = vld [vmem:[#allocation2 + $0x10] sm:$0xff]  ;;  %v392_v10 = vld [vmem:[#allocation2 + $0x8] sm:$0xff] }
   0x9   :  { %v391_v11 = vld [vmem:[#allocation2] sm:$0xff]  ;;  %v402_v13 = vld [vmem:[#allocation2 + $0x58] sm:$0xff]  ;;  %v401_v14 = vld [vmem:[#allocation2 + $0x50] sm:$0xff] }
   0xa   :  { %138 = vmatpush.bf16.msra.mxu0 %v397_v1  ;;  %v390_v12 = vld [vmem:[%s474_s0] sm:$0xff]  ;;  %v400_v15 = vld [vmem:[#allocation2 + $0x48] sm:$0xff]  ;;  %v414_v17 = vld [vmem:[#allocation2 + $0xb8] sm:$0xff] }
   0xb   :  { %204 = vmatpush.bf16.msra.mxu1 %v405_v3  ;;  %v399_v16 = vld [vmem:[#allocation2 + $0x40] sm:$0xff]  ;;  %269 = vmatpush.bf16.msra.mxu2 %v414_v17  ;;  %v413_v18 = vld [vmem:[#allocation2 + $0xb0] sm:$0xff]  ;;  %v412_v19 = vld [vmem:[#allocation2 + $0xa8] sm:$0xff] }
   0xc   :  { %v411_v20 = vld [vmem:[#allocation2 + $0xa0] sm:$0xff]  ;;  %v44_v21 = vld [vmem:[#allocation2 + $0x3c] sm:$0xf]  ;;  %v409_v32 = vld [vmem:[#allocation2 + $0x90] sm:$0xff] }
   0xd   :  { %v79_v22 = vunpack.c.l.bf16 %v44_v21  ;;  %v410_v31 = vld [vmem:[#allocation2 + $0x98] sm:$0xff]  ;;  %v408_v33 = vld [vmem:[#allocation2 + $0x88] sm:$0xff]  ;;  %v407_v34 = vld [vmem:[#allocation2 + $0x80] sm:$0xff] }
   0xe   :  { %139 = vmatpush.bf16.msra.mxu0 %v396_v4  ;;  %v61_v35 = vld [vmem:[#allocation2 + $0x7c] sm:$0xf] }
   0xf   :  { %205 = vmatpush.bf16.msra.mxu1 %v404_v5  ;;  %270 = vmatpush.bf16.msra.mxu2 %v413_v18  ;;  %v82_v24 = vperm.slane %v79_v22, 7  ;;  %v80_v36 = vunpack.c.l.bf16 %v61_v35  ;;  %v78_v45 = vld [vmem:[#allocation2 + $0xbc] sm:$0xf] }
  0x10   :  { %v81_v46 = vunpack.c.l.bf16 %v78_v45 }
  0x11   :  { %v154_v38 = vperm.slane %v80_v36, 7 }
  0x12   :  { %140 = vmatpush.bf16.msra.mxu0 %v395_v6  ;;  %v220_v47 = vperm.slane %v81_v46, 7 }
  0x13   :  { %206 = vmatpush.bf16.msra.mxu1 %v403_v7  ;;  %271 = vmatpush.bf16.msra.mxu2 %v412_v19 }
  0x16   :  { %141 = vmatpush.bf16.msra.mxu0 %v394_v8 }
  0x17   :  { %207 = vmatpush.bf16.msra.mxu1 %v402_v13  ;;  %272 = vmatpush.bf16.msra.mxu2 %v411_v20 }
  0x1a   :  { %142 = vmatpush.bf16.msra.mxu0 %v393_v9 }
  0x1b   :  { %208 = vmatpush.bf16.msra.mxu1 %v401_v14  ;;  %273 = vmatpush.bf16.msra.mxu2 %v410_v31 }
  0x1e   :  { %143 = vmatpush.bf16.msra.mxu0 %v392_v10 }
  0x1f   :  { %209 = vmatpush.bf16.msra.mxu1 %v400_v15  ;;  %274 = vmatpush.bf16.msra.mxu2 %v409_v32 }
  0x22   :  { %144 = vmatpush.bf16.msra.mxu0 %v391_v11 }
  0x23   :  { %210 = vmatpush.bf16.msra.mxu1 %v399_v16  ;;  %275 = vmatpush.bf16.msra.mxu2 %v408_v33 }
  0x25   :  { %145 = vmatmul.bf16.vlgmr.msra.gmra.mxu0 %v390_v12 }
  0x27   :  { %276 = vmatpush.bf16.msra.mxu2 %v407_v34 }
  0xa2   :  { %v146_v23 = vpop.f32.mrf.mxu0 }
  0xa3   :  { %v147_v25 = vadd.f32 %v146_v23, %v82_v24 }
  0xa5   :  { %v151_v28 = vmax.f32 %v147_v25, 0.0 }
  0xaa   :  { %v148_v26 = vpop.f32.mrf.mxu0 }
  0xab   :  { %v149_v27 = vadd.f32 %v148_v26, %v82_v24 }
  0xad   :  { %v152_v29 = vmax.f32 %v149_v27, 0.0 }
  0xaf   :  { %v153_v30 = vpack.c.bf16 %v152_v29, %v151_v28 }
  0xb1   :  { %211 = vmatmul.bf16.vlgmr.msra.gmra.mxu1 %v153_v30 }
 0x12e   :  { %v212_v37 = vpop.f32.mrf.mxu1 }
 0x12f   :  { %v213_v39 = vadd.f32 %v212_v37, %v154_v38 }
 0x131   :  { %v217_v42 = vmax.f32 %v213_v39, 0.0 }
 0x136   :  { %v214_v40 = vpop.f32.mrf.mxu1 }
 0x137   :  { %v215_v41 = vadd.f32 %v214_v40, %v154_v38 }
 0x139   :  { %v218_v43 = vmax.f32 %v215_v41, 0.0 }
 0x13b   :  { %v219_v44 = vpack.c.bf16 %v218_v43, %v217_v42 }
 0x13d   :  { %277 = vmatmul.bf16.vlgmr.msra.gmra.mxu2 %v219_v44 }
 0x1c0   :  { %v278_v48 = vpop.f32.mrf.mxu2 }
 0x1c1   :  { %v279_v49 = vadd.f32 %v278_v48, %v220_v47 }
 0x1c3   :  { %283 = vst [vmem:[%s476_s2] sm:$0xff] %v279_v49 }
 0x1c8   :  { %v280_v50 = vpop.f32.mrf.mxu2 }
 0x1c9   :  { %v281_v51 = vadd.f32 %v280_v50, %v220_v47 }
 0x1cb   :  { %284 = vst [vmem:[%s476_s2 + $0x8] sm:$0xff] %v281_v51 }
 0x1cc   :  { %289 = vsyncpa [#allocation3], 1 }

</bundles_post_ra>
